<compile_context>
chip_gen: v7x
topology: tpu7x:2x2x1
jax: 0.10.0
libtpu: 0.0.40
codegen_flags: <defaults>
</compile_context>

<pallas_src>
import jax
import jax.numpy as jnp
from jax.experimental import pallas as pl
from jax.experimental.pallas import tpu as pltpu


def _cfg_kernel(w_ref, x_ref, coef_ref, o_ref):
    # w_ref:    VMEM [R, R]  bf16  -- kron(I_bblk, Wc^T), block-diagonal, static
    # x_ref:    VMEM [R, P]  bf16  -- flattened latent rows (R = bblk*C, P = H*W)
    # coef_ref: VMEM [R, 3]  f32   -- per-row (c_out, c_skip, c_out*bias_mix)
    # o_ref:    VMEM [R, P]  bf16
    xb = x_ref[...]                                                   # load once
    h = jnp.dot(w_ref[...], xb, preferred_element_type=jnp.float32)   # one MXU pass
    coef = coef_ref[...]
    c_out = coef[:, 0:1]      # [R, 1] broadcast along lanes
    c_skip = coef[:, 1:2]
    bias = coef[:, 2:3]       # already includes c_out and the guidance mix
    o_ref[...] = (h * c_out + xb.astype(jnp.float32) * c_skip + bias).astype(o_ref.dtype)


def _pick_bblk(B, C, P):
    """Rows per grid step: target one full 256-row MXU pass, cap by VMEM."""
    rows_target = 256                       # v6e/v7x MXU is 2x256x256 (v5e pays 2 passes, still fine)
    bytes_per_row = P * 2                   # bf16
    # double-buffered x + out blocks <= ~8 MiB (safe under v5e 16 MiB scoped default
    # and v7x 32 MiB scoped / 64 MiB physical)
    max_rows_vmem = max(C, (8 << 20) // (4 * bytes_per_row))
    rows_cap = max(C, min(rows_target, max_rows_vmem))
    best = B                                # fallback: single grid step (full-array block, always legal)
    for bblk in range(1, B + 1):
        if B % bblk:
            continue
        rows = bblk * C
        if rows > rows_cap:
            break
        # when splitting into multiple grid steps, the sublane dim must be a multiple of 8
        if bblk == B or rows % 8 == 0:
            best = bblk
    return best


def cfg_denoiser(x_nchw, sigma, uncond, cond, cond_scale, wc, wp):
    """x_nchw: [B, C, H, W]; sigma: [B]; uncond/cond: [B, S, Hd]; wc: [C, C]; wp: [Hd, C].

    Activations/weights are DMA'd as bf16; MXU accumulation and elementwise math are f32.
    Output is bf16 with shape [B, C, H, W].
    """
    B, C, H, W = x_nchw.shape
    P = H * W

    # Lane-dense, sublane-folded layout: [B*C, P] is a free contiguous reshape of NCHW.
    x = x_nchw.reshape(B * C, P).astype(jnp.bfloat16)

    # ---- hoisted conditioning-bias path (valid because the stand-in model is linear) ----
    uc_mean = jnp.mean(uncond.astype(jnp.float32), axis=1)            # [B, Hd]
    c_mean = jnp.mean(cond.astype(jnp.float32), axis=1)               # [B, Hd]
    mix = uc_mean + (c_mean - uc_mean) * cond_scale                   # guidance mix, [B, Hd]
    bias = mix @ wp.astype(jnp.float32)                               # [B, C]

    # Per-batch denoiser coefficients (k-diffusion c_out / c_skip), hoisted to the wrapper.
    sig = sigma.astype(jnp.float32)
    denom = sig * sig + 1.0
    c_out = 1.0 / denom                                               # [B]
    c_skip = sig / denom                                              # [B]

    # Single per-row coefficient operand: columns = (c_out, c_skip, c_out * bias_mix).
    coef = jnp.stack(
        [
            jnp.repeat(c_out, C),
            jnp.repeat(c_skip, C),
            (bias * c_out[:, None]).reshape(B * C),
        ],
        axis=1,
    ).astype(jnp.float32)                                             # [B*C, 3]

    # Block sizing and the static block-diagonal weight kron(I_bblk, Wc^T).
    bblk = _pick_bblk(B, C, P)
    R = bblk * C
    nsteps = B // bblk
    w_big = jnp.kron(
        jnp.eye(bblk, dtype=jnp.float32), jnp.transpose(wc).astype(jnp.float32)
    ).astype(jnp.bfloat16)                                            # [R, R], <=128 KiB

    out = pl.pallas_call(
        _cfg_kernel,
        out_shape=jax.ShapeDtypeStruct((B * C, P), jnp.bfloat16),
        grid=(nsteps,),
        in_specs=[
            pl.BlockSpec((R, R), lambda i: (0, 0)),   # block-diag weight (resident)
            pl.BlockSpec((R, P), lambda i: (i, 0)),   # x rows
            pl.BlockSpec((R, 3), lambda i: (i, 0)),   # per-row coefficients
        ],
        out_specs=pl.BlockSpec((R, P), lambda i: (i, 0)),
        compiler_params=pltpu.CompilerParams(dimension_semantics=("parallel",)),
    )(w_big, x, coef)

    return out.reshape(B, C, H, W)


# ----- pure-JAX reference mirroring the PyTorch forward exactly (f32) --------
def _inner_model_ref(x_in, sigma_in, cond_in, wc, wp):
    x_in = x_in.astype(jnp.float32)
    sigma_in = sigma_in.astype(jnp.float32)
    cond_in = cond_in.astype(jnp.float32)
    wc = wc.astype(jnp.float32)
    wp = wp.astype(jnp.float32)
    B2, C, H, W = x_in.shape
    xf = jnp.transpose(x_in, (0, 2, 3, 1)).reshape(B2, H * W, C)
    denom = sigma_in ** 2 + 1.0
    c_out = (1.0 / denom)[:, None, None]
    c_skip = (sigma_in / denom)[:, None, None]
    cbias = jnp.mean(cond_in, axis=1) @ wp                      # [2B, C]
    h = xf @ wc + cbias[:, None, :]
    eps = h * c_out + xf * c_skip
    return jnp.transpose(eps.reshape(B2, H, W, C), (0, 3, 1, 2))


def cfg_denoiser_ref(x, sigma, uncond, cond, cond_scale, wc, wp):
    x_in = jnp.concatenate([x] * 2)
    sigma_in = jnp.concatenate([sigma] * 2)
    cond_in = jnp.concatenate([uncond, cond])
    eps = _inner_model_ref(x_in, sigma_in, cond_in, wc, wp)
    u, c = jnp.split(eps, 2, axis=0)
    return u + (c - u) * cond_scale


if __name__ == "__main__":
    B, C, H, W = 2, 4, 16, 16
    S, Hd = 8, 32
    cond_scale = 7.5

    key = jax.random.PRNGKey(0)
    k_x, k_s, k_u, k_c, k_wc, k_wp = jax.random.split(key, 6)
    x = jax.random.normal(k_x, (B, C, H, W), jnp.float32)
    sigma = jax.random.uniform(k_s, (B,), jnp.float32, minval=0.1, maxval=10.0)
    uncond = jax.random.normal(k_u, (B, S, Hd), jnp.float32)
    cond = jax.random.normal(k_c, (B, S, Hd), jnp.float32)
    # Deterministic synthetic "inner model" weights.
    wc = jax.random.normal(k_wc, (C, C), jnp.float32) * 0.5
    wp = jax.random.normal(k_wp, (Hd, C), jnp.float32) * 0.1

    # Half-precision activations/weights (the kernel's DMA dtype). The reference
    # consumes the same quantized values so the comparison isolates kernel math
    # (only remaining delta: f32 reassociation + bf16 MXU operands + bf16 output rounding).
    x_bf = x.astype(jnp.bfloat16)
    uncond_bf = uncond.astype(jnp.bfloat16)
    cond_bf = cond.astype(jnp.bfloat16)
    wc_bf = wc.astype(jnp.bfloat16)
    wp_bf = wp.astype(jnp.bfloat16)

    out = cfg_denoiser(x_bf, sigma, uncond_bf, cond_bf, cond_scale, wc_bf, wp_bf)
    out = jax.block_until_ready(out)

    ref = cfg_denoiser_ref(x_bf, sigma, uncond_bf, cond_bf, cond_scale, wc_bf, wp_bf)

    assert out.shape == (B, C, H, W)
    assert out.dtype == jnp.bfloat16
    assert jnp.allclose(out.astype(jnp.float32), ref, atol=1e-2, rtol=1e-2), \
        "mismatch vs reference"
    print("KERNEL_OK")
</pallas_src>

<mosaic_0001>
module attributes {stable_mosaic.version = 11 : i64} {
  func.func @_cfg_kernel(%arg0: i32, %arg1: memref<8x8xbf16, #tpu.memory_space<vmem>>, %arg2: memref<8x256xbf16, #tpu.memory_space<vmem>>, %arg3: memref<8x3xf32, #tpu.memory_space<vmem>>, %arg4: memref<8x256xbf16, #tpu.memory_space<vmem>>) attributes {dimension_semantics = [#tpu.dimension_semantics<parallel>], iteration_bounds = array<i64: 1>, scalar_prefetch = 0 : i64, scratch_operands = 0 : i64, tpu.core_type = #tpu.core_type<tc>, window_params = [{pipeline_mode = #tpu.pipeline_mode<synchronous>, transform_indices = @transform_0, window_bounds = array<i64: 8, 8>}, {transform_indices = @transform_1, window_bounds = array<i64: 8, 256>}, {transform_indices = @transform_2, window_bounds = array<i64: 8, 3>}, {transform_indices = @transform_3, window_bounds = array<i64: 8, 256>}]} {
    %c0 = arith.constant 0 : index
    %c0_0 = arith.constant 0 : index
    %0 = vector.load %arg2[%c0, %c0_0] : memref<8x256xbf16, #tpu.memory_space<vmem>>, vector<8x256xbf16>
    %c0_1 = arith.constant 0 : index
    %c0_2 = arith.constant 0 : index
    %1 = vector.load %arg1[%c0_1, %c0_2] : memref<8x8xbf16, #tpu.memory_space<vmem>>, vector<8x8xbf16>
    %cst = arith.constant dense<0.000000e+00> : vector<8x256xf32>
    %2 = tpu.matmul %1, %0, %cst {dimension_numbers = #tpu.dot_dimension_numbers<[1], [0], [0], [1], [0, 0, 1, 1], [], []>} : vector<8x8xbf16>, vector<8x256xbf16>, vector<8x256xf32> -> vector<8x256xf32>
    %c0_3 = arith.constant 0 : index
    %c0_4 = arith.constant 0 : index
    %3 = vector.load %arg3[%c0_3, %c0_4] : memref<8x3xf32, #tpu.memory_space<vmem>>, vector<8x3xf32>
    %4 = vector.extract_strided_slice %3 {offsets = [0, 0], sizes = [8, 1], strides = [1, 1]} : vector<8x3xf32> to vector<8x1xf32>
    %5 = vector.extract_strided_slice %3 {offsets = [0, 1], sizes = [8, 1], strides = [1, 1]} : vector<8x3xf32> to vector<8x1xf32>
    %6 = vector.extract_strided_slice %3 {offsets = [0, 2], sizes = [8, 1], strides = [1, 1]} : vector<8x3xf32> to vector<8x1xf32>
    %7 = vector.broadcast %4 : vector<8x1xf32> to vector<8x256xf32>
    %8 = arith.mulf %2, %7 : vector<8x256xf32>
    %9 = arith.extf %0 : vector<8x256xbf16> to vector<8x256xf32>
    %10 = vector.broadcast %5 : vector<8x1xf32> to vector<8x256xf32>
    %11 = arith.mulf %9, %10 : vector<8x256xf32>
    %12 = arith.addf %8, %11 : vector<8x256xf32>
    %13 = vector.broadcast %6 : vector<8x1xf32> to vector<8x256xf32>
    %14 = arith.addf %12, %13 : vector<8x256xf32>
    %15 = arith.truncf %14 : vector<8x256xf32> to vector<8x256xbf16>
    %c0_5 = arith.constant 0 : index
    %c0_6 = arith.constant 0 : index
    %16 = vector.load %arg4[%c0_5, %c0_6] : memref<8x256xbf16, #tpu.memory_space<vmem>>, vector<8x256xbf16>
    tpu.vector_store %arg4[%c0_5, %c0_6], %15 {strides = array<i32>} : memref<8x256xbf16, #tpu.memory_space<vmem>>, vector<8x256xbf16>,
    return
  }
  func.func @transform_0(%arg0: i32) -> (i32, i32) {
    %c0_i32 = arith.constant 0 : i32
    %c0_i32_0 = arith.constant 0 : i32
    %c0_i32_1 = arith.constant 0 : i32
    return %c0_i32, %c0_i32_0 : i32, i32
  }
  func.func @transform_1(%arg0: i32) -> (i32, i32) {
    %c0_i32 = arith.constant 0 : i32
    %c0_i32_0 = arith.constant 0 : i32
    return %arg0, %c0_i32 : i32, i32
  }
  func.func @transform_2(%arg0: i32) -> (i32, i32) {
    %c0_i32 = arith.constant 0 : i32
    %c0_i32_0 = arith.constant 0 : i32
    return %arg0, %c0_i32 : i32, i32
  }
  func.func @transform_3(%arg0: i32) -> (i32, i32) {
    %c0_i32 = arith.constant 0 : i32
    %c0_i32_0 = arith.constant 0 : i32
    return %arg0, %c0_i32 : i32, i32
  }
}

</mosaic_0001>

<bundles_post_ra>
// kernel: tpu_custom_call.1
= control target key start
LH: loop header
LB: loop body
LE: loop exit
PB: predicated region body
PF: predicated region fallthrough
CT: control target
= control target key end

     0   :  { %vm27_vm0 = vcmask 1043456   ;;  %v162_v3 = vmov 0   ;;  %s207_s0 = inlined_call_operand.vmem [shape: bf16[8,8], index: 0, kind: input, shape index: {}]   ;;  %s208_s1 = inlined_call_operand.vmem [shape: bf16[8,256], index: 1, kind: input, shape index: {}]   ;;  %s209_s2 = inlined_call_operand.vmem [shape: f32[8,3], index: 2, kind: input, shape index: {}]   ;;  %s210_s3 = inlined_call_operand.hbm [shape: bf16[8,256], index: 3, kind: output, shape index: {}]  }
   0x1   :  { %v16_v0 = vld [vmem:[%s208_s1] sm:$0xff]  ;;  %66 = vmatprep.mubr.bf16.mxu0 %v162_v3  ;;  %132 = vset.pattern.permute.xlu0 %v162_v3 }
   0x2   :  { %v123_v1 = vcombine.high %v16_v0, %v16_v0  ;;  %v122_v2 = vcombine.low %v16_v0, %v16_v0  ;;  %v75_v4 = vld [vmem:[%s209_s2] sm:$0xff] }
   0x3   :  { %8 = vsyncpa [#allocation3], 0  ;;  %78 = vperm.xlu0 %132, %v75_v4   ;;  %v163_v5 = vmov 2   ;;  %v17_v7 = vld [vmem:[%s207_s0] sm:$0xf]  ;;  %vm23_vm1 = vcmask 64512   ;;  %v83_v10 = vunpack.c.l.bf16 %v16_v0  ;;  %v84_v12 = vunpack.c.h.bf16 %v16_v0 }
   0x4   :  { %134 = vset.pattern.permute.xlu1 %v163_v5  ;;  %124 = vmatprep.subr.msk.bf16.mxu0 %vm27_vm0, %v123_v1  ;;  %v29_v6 = vsel %vm27_vm0, %v122_v2, 0  ;;  %v164_v8 = vmov 1   ;;  %s165_s0 = smov [#allocation2]  }
   0x5   :  { %94 = vperm.xlu1 %134, %v75_v4   ;;  %35 = vmatpush1.bf16.msra.mxu0 %v29_v6  ;;  %s114_s2 = sshll.u32 %s165_s0, 4  ;;  %s115_s2 = int_to_ptr.vmem [resolvable:$true] %s114_s2 }
   0x6   :  { %s138_s17 = scalar_lea.vmem %s115_s2, 128  ;;  %p143_p1 = scmp.lt.s32.totalorder %s115_s2, %s115_s2 }
   0x7   :  { %133 = vset.pattern.permute.xlu0 %v164_v8  ;;  %p139_p0 = scmp.ne.s32.totalorder %s115_s2, %s138_s17  ;;  %p144_p2 = scmp.lt.s32.totalorder %s138_s17, %s138_s17 }
   0x8   :  { %125 = vmatmul.mubr.msk.bf16.vlgmr.msra.gmra.mrb[0].mxu0 %vm23_vm1, %v17_v7  ;;  %86 = vperm.xlu0 %133, %v75_v4  }
   0x9   :  { %p145_p3 = por %p144_p2, %p143_p1 }
   0xb   :  { %p146_p4 = pnand %p145_p3, %p139_p0 }
   0xc   :  { %135 = vset.pattern.permute.xlu0 %v163_v5 }
  0x82   :  { %v79_v9 = vpop.permute.xlu0 %78 }
  0x84   :  { %v95_v20 = vpop.permute.xlu1 %94 }
  0x87   :  { %v87_v11 = vpop.permute.xlu0 %86 }
  0x88   :  { %v89_v13 = vmul.f32 %v87_v11, %v83_v10  ;;  %v90_v14 = vmul.f32 %v87_v11, %v84_v12 }
  0xdb   :  { %v68_v15 = vpop.f32.mrb[0].mxu0 }
  0xdc   :  { %v81_v16 = vmul.f32 %v79_v9, %v68_v15  ;;  %v70_v17 = vpop.f32.mrb[1].mxu0 }
  0xdd   :  { %v82_v18 = vmul.f32 %v79_v9, %v70_v17  ;;  %v72_v19 = vpop.f32.mrb[2].mxu0 }
  0xde   :  { %v73_v21 = vpop.f32.mrb[3].mxu0  ;;  %v91_v22 = vadd.f32 %v89_v13, %v81_v16 }
  0xdf   :  { %v92_v23 = vadd.f32 %v90_v14, %v82_v18 }
  0xe0   :  { %v97_v24 = vadd.f32 %v95_v20, %v91_v22 }
  0xe1   :  { %v98_v25 = vadd.f32 %v95_v20, %v92_v23 }
  0xe3   :  { %v127_v26 = vpack.c.bf16 %v98_v25, %v97_v24 }
  0xe5   :  { %107 = vst [vmem:[#allocation2] sm:$0xff] %v127_v26 }
  0xe6   :  { %149 = shalt.err (!%p146_p4)
}
  0xe7   :  { %s150_s20 = scalar_lea.hbm %s210_s3, 128 }
  0xe8   :  { %p151_p5 = scmp.ne.s32.totalorder %s210_s3, %s150_s20  ;;  %p154_p6 = scmp.lt.u32.totalorder %s150_s20, %s210_s3 }
  0xea   :  { %p156_p7 = pnand %p154_p6, %p151_p5 }
  0xec   :  { %159 = shalt.err (!%p156_p7)
}
  0xed   :  { %117 = dma.vmem_to_hbm [thread:$0]  %s115_s2, 128, %s210_s3, [#allocation3]  }
  0xee   :  { %160 = dma.done.wait [#allocation3], 128  }
  0xef   :  { %161 = vsyncadd [#allocation3], 4294967168 }
  0xf0   :  { %121 = vsyncpa [#allocation3], 1 }

</bundles_post_ra>
